<compile_context>
chip_gen: v7x
topology: tpu7x:2x2x1
jax: 0.10.0
libtpu: 0.0.40
codegen_flags: <defaults>
</compile_context>

<pallas_src>
import functools
import math

import jax
import jax.numpy as jnp
from jax import lax
from jax.experimental import pallas as pl
from jax.experimental.pallas import tpu as pltpu


# --------------------------------- kernel -----------------------------------
def _conv_block_kernel(x_ref, w1_ref, w2_ref, bn1_ref, bn2_ref,
                       fold_ref, spread_ref, o_ref, *, N, H, W, eps):
    """Fused [conv3x3 -> BN(batch stats) -> ReLU] x 2.

    x_ref      : (N*H, W*C1p)       bf16  input rows, channels fastest on lanes
    w1_ref     : (3*W*C1p, W*C2)    bf16  stacked block-banded weights, layer 1
    w2_ref     : (3*W*C2,  W*C2)    bf16  stacked block-banded weights, layer 2
    bn1/2_ref  : (2, C2)            f32   row 0 = gamma, row 1 = beta
    fold_ref   : (W*C2, C2)         f32   per-channel fold (sum over W positions)
    spread_ref : (C2, W*C2)         f32   fold.T — broadcast channel values over W
    o_ref      : (N*H, W*C2)        f32   lane-dense output
    """
    NH = N * H
    inv_nhw = 1.0 / float(N * H * W)

    def bands(x2d):
        # x2d: (NH, K) bf16, K = W*Cin.  Build the dh = 0/1/2 row bands of the
        # 3x3 conv with sublane shifts; zero the per-image H halo with an
        # iota(row % H) mask.  Pure vreg work (XLU shifts + VPU selects) —
        # no padded VMEM scratch, no misaligned stores.
        K = x2d.shape[1]
        zeros = jnp.zeros_like(x2d)
        h = lax.broadcasted_iota(jnp.int32, (NH, K), 0) % H
        up = jnp.concatenate([zeros[:1], x2d[:NH - 1]], axis=0)   # row h-1
        up = jnp.where(h == 0, zeros, up)
        dn = jnp.concatenate([x2d[1:], zeros[:1]], axis=0)        # row h+1
        dn = jnp.where(h == H - 1, zeros, dn)
        return jnp.concatenate([up, x2d, dn], axis=1)             # (NH, 3K)

    def conv_bn_relu(x2d_bf16, w_ref, bn):
        # One MXU pass per layer: (NH, 3*W*Cin) @ (3*W*Cin, W*C2),
        # bf16 operands, f32 accumulation.  W padding / tap structure is
        # folded into the stacked banded weights.
        acc = jnp.dot(bands(x2d_bf16), w_ref[...],
                      preferred_element_type=jnp.float32)          # (NH, W*C2) f32

        # BatchNorm2d, training-mode batch stats over (N, H, W) per channel
        # (biased variance).  One stats pass, one fold matmul, one spread
        # matmul, then a single fused scale*x + bias + ReLU pass.
        ssum = jnp.concatenate(
            [jnp.sum(acc, axis=0, keepdims=True),
             jnp.sum(acc * acc, axis=0, keepdims=True)], axis=0)   # (2, W*C2)
        stat = jnp.dot(ssum, fold_ref[...],
                       preferred_element_type=jnp.float32) * inv_nhw   # (2, C2)
        mean = stat[0:1]
        var = jnp.maximum(stat[1:2] - mean * mean, 0.0)
        gamma, beta = bn[0:1], bn[1:2]
        scale = gamma * lax.rsqrt(var + eps)                       # (1, C2)
        bias = beta - mean * scale                                 # (1, C2)
        sb = jnp.dot(jnp.concatenate([scale, bias], axis=0), spread_ref[...],
                     preferred_element_type=jnp.float32)           # (2, W*C2)
        return jnp.maximum(acc * sb[0:1] + sb[1:2], 0.0)           # (NH, W*C2)

    # Layer 1; the inter-layer activation never leaves VMEM/vregs.
    h1 = conv_bn_relu(x_ref[...], w1_ref, bn1_ref[...])
    # Layer 2; single bf16 cast of the resident activation.
    h2 = conv_bn_relu(h1.astype(jnp.bfloat16), w2_ref, bn2_ref[...])

    # Lane-dense store: last dim = W*C2 (128 for the test shape).
    o_ref[...] = h2


# ------------------------------ host-side prep ------------------------------
def _band_weights(w_hwio, W, dtype=jnp.bfloat16):
    """Fold 3x3 HWIO weights + W zero-padding into one stacked banded matrix.

    Returns (3*W*Cin, W*Cout): rows [dh*W*Cin : (dh+1)*W*Cin] hold
    B_dh[(w+dw-1)*Cin + ci, w*Cout + co] = w_hwio[dh, dw, ci, co]
    (terms with w+dw-1 outside [0, W) dropped == zero-padding along W).
    """
    Cin, Cout = w_hwio.shape[2], w_hwio.shape[3]
    bands = []
    for dh in range(3):
        m = jnp.zeros((W * Cin, W * Cout), jnp.float32)
        for dw in range(3):
            sel = jnp.eye(W, W, k=1 - dw, dtype=jnp.float32)   # wloc = w + dw - 1
            m = m + jnp.kron(sel, w_hwio[dh, dw].astype(jnp.float32))
        bands.append(m)
    return jnp.concatenate(bands, axis=0).astype(dtype)


@jax.jit
def conv_block_forward(x_nchw, params):
    """Full conv_block forward.  Input/output NCHW (PyTorch convention)."""
    eps = 1e-5
    N, C1, H, W = x_nchw.shape
    C2 = params["w1"].shape[-1]

    # Pad input channels so the band lane width W*C1p is a multiple of 128:
    # full-depth MXU K passes (v5e) and lane-aligned band concatenation.
    # Padded channels are zero in both activations and banded weights -> exact.
    lane = 128
    step = lane // math.gcd(W, lane)
    C1p = -(-C1 // step) * step

    # NCHW -> (N*H, W*C) row layout, channels fastest on the lane axis; bf16 once.
    x_rows = jnp.transpose(x_nchw, (0, 2, 3, 1))                   # NHWC
    if C1p != C1:
        x_rows = jnp.pad(x_rows, ((0, 0), (0, 0), (0, 0), (0, C1p - C1)))
    x_rows = x_rows.reshape(N * H, W * C1p).astype(jnp.bfloat16)

    w1 = params["w1"]
    if C1p != C1:
        w1 = jnp.pad(w1, ((0, 0), (0, 0), (0, C1p - C1), (0, 0)))
    wb1 = _band_weights(w1, W)                                  # (3*W*C1p, W*C2) bf16
    wb2 = _band_weights(params["w2"], W)                        # (3*W*C2,  W*C2) bf16

    bn1 = jnp.stack([params["g1"], params["beta1"]]).astype(jnp.float32)   # (2, C2)
    bn2 = jnp.stack([params["g2"], params["beta2"]]).astype(jnp.float32)   # (2, C2)
    fold = jnp.tile(jnp.eye(C2, dtype=jnp.float32), (W, 1))                # (W*C2, C2)
    spread = fold.T                                                        # (C2, W*C2)
    # NOTE: conv biases b1/b2 intentionally not passed — training-mode BN
    # subtracts the batch mean, which cancels them exactly.

    # Gridless, whole-problem-in-VMEM design: only valid for small shapes.
    est_bytes = (x_rows.size * 2 + wb1.size * 2 + wb2.size * 2   # bf16 inputs
                 + N * H * W * C2 * 4 * 3                        # out + live acc/h1
                 + 16 * W * C2 * 4)                              # BN/fold/spread
    assert est_bytes < 12 * 1024 * 1024, \
        "TODO(synk): row-band grid + two-pass cross-tile BN needed at this size"

    kernel = functools.partial(_conv_block_kernel, N=N, H=H, W=W, eps=eps)
    vmem = pl.BlockSpec(memory_space=pltpu.MemorySpace.VMEM)

    out2d = pl.pallas_call(
        kernel,
        out_shape=jax.ShapeDtypeStruct((N * H, W * C2), jnp.float32),
        in_specs=[vmem] * 7,
        out_specs=vmem,
        compiler_params=pltpu.CompilerParams(vmem_limit_bytes=32 * 1024 * 1024),
    )(x_rows, wb1, wb2, bn1, bn2, fold, spread)

    return jnp.transpose(out2d.reshape(N, H, W, C2), (0, 3, 1, 2))


# ----------------------------- reference (pure JAX) --------------------------
def _ref_layer(x_nchw, w_hwio, b, gamma, beta, eps=1e-5):
    w_oihw = jnp.transpose(w_hwio, (3, 2, 0, 1))
    y = lax.conv_general_dilated(
        x_nchw, w_oihw, window_strides=(1, 1), padding=((1, 1), (1, 1)),
        dimension_numbers=("NCHW", "OIHW", "NCHW"),
        preferred_element_type=jnp.float32)
    y = y + b.reshape(1, -1, 1, 1)
    mean = jnp.mean(y, axis=(0, 2, 3), keepdims=True)
    var = jnp.mean((y - mean) ** 2, axis=(0, 2, 3), keepdims=True)
    y = (y - mean) * lax.rsqrt(var + eps)
    y = y * gamma.reshape(1, -1, 1, 1) + beta.reshape(1, -1, 1, 1)
    return jnp.maximum(y, 0.0)


def conv_block_ref(x_nchw, params):
    x = _ref_layer(x_nchw, params["w1"], params["b1"], params["g1"], params["beta1"])
    x = _ref_layer(x, params["w2"], params["b2"], params["g2"], params["beta2"])
    return x


# ----------------------------------- main ------------------------------------
if __name__ == "__main__":
    key = jax.random.PRNGKey(0)
    N, C_in, C_out, H, W = 2, 4, 8, 16, 16

    k_x, k_w1, k_b1, k_g1, k_be1, k_w2, k_b2, k_g2, k_be2 = jax.random.split(key, 9)

    x = jax.random.normal(k_x, (N, C_in, H, W), dtype=jnp.float32)

    # Deterministic synthetic parameters (shapes from nn.Conv2d / nn.BatchNorm2d).
    params = {
        "w1": jax.random.normal(k_w1, (3, 3, C_in, C_out), jnp.float32) * 0.1,
        "b1": jax.random.normal(k_b1, (C_out,), jnp.float32) * 0.1,
        "g1": 1.0 + 0.1 * jax.random.normal(k_g1, (C_out,), jnp.float32),
        "beta1": 0.1 * jax.random.normal(k_be1, (C_out,), jnp.float32),
        "w2": jax.random.normal(k_w2, (3, 3, C_out, C_out), jnp.float32) * 0.1,
        "b2": jax.random.normal(k_b2, (C_out,), jnp.float32) * 0.1,
        "g2": 1.0 + 0.1 * jax.random.normal(k_g2, (C_out,), jnp.float32),
        "beta2": 0.1 * jax.random.normal(k_be2, (C_out,), jnp.float32),
    }

    out = jax.block_until_ready(conv_block_forward(x, params))
    assert out.shape == (N, C_out, H, W)
    assert bool(jnp.all(jnp.isfinite(out)))

    # Check vs the full-f32 module semantics.  Tolerance accounts for the bf16
    # matmul operands (f32 accumulation) used inside the kernel — after two
    # BN+ReLU layers the expected deviation is ~1e-2 on O(1) outputs.
    ref = jax.block_until_ready(conv_block_ref(x, params))
    max_err = float(jnp.max(jnp.abs(out - ref)))
    assert jnp.allclose(out, ref, atol=5e-2, rtol=5e-2), \
        f"mismatch vs f32 reference (max abs err {max_err:.4f})"

    print("KERNEL_OK")
</pallas_src>

<mosaic_0001>
module attributes {stable_mosaic.version = 11 : i64} {
  func.func @_conv_block_kernel(%arg0: memref<32x128xbf16, #tpu.memory_space<vmem>>, %arg1: memref<384x128xbf16, #tpu.memory_space<vmem>>, %arg2: memref<384x128xbf16, #tpu.memory_space<vmem>>, %arg3: memref<2x8xf32, #tpu.memory_space<vmem>>, %arg4: memref<2x8xf32, #tpu.memory_space<vmem>>, %arg5: memref<128x8xf32, #tpu.memory_space<vmem>>, %arg6: memref<8x128xf32, #tpu.memory_space<vmem>>, %arg7: memref<32x128xf32, #tpu.memory_space<vmem>>) attributes {dimension_semantics = [], scalar_prefetch = 0 : i64, scratch_operands = 0 : i64, tpu.core_type = #tpu.core_type<tc>} {
    %c0 = arith.constant 0 : index
    %c0_0 = arith.constant 0 : index
    %0 = vector.load %arg0[%c0, %c0_0] : memref<32x128xbf16, #tpu.memory_space<vmem>>, vector<32x128xbf16>
    %c0_1 = arith.constant 0 : index
    %c0_2 = arith.constant 0 : index
    %1 = vector.load %arg3[%c0_1, %c0_2] : memref<2x8xf32, #tpu.memory_space<vmem>>, vector<2x8xf32>
    %cst = arith.constant 0.000000e+00 : bf16
    %2 = vector.broadcast %cst : bf16 to vector<32x128xbf16>
    %3 = tpu.iota {dimensions = array<i32: 0>} : vector<32x128xi32>
    %c16_i32 = arith.constant 16 : i32
    %c0_i32 = arith.constant 0 : i32
    %4 = arith.cmpi eq, %c16_i32, %c0_i32 : i32
    %c1_i32 = arith.constant 1 : i32
    %5 = arith.select %4, %c1_i32, %c16_i32 : i32
    %6 = vector.broadcast %5 : i32 to vector<32x128xi32>
    %7 = arith.remsi %3, %6 : vector<32x128xi32>
    %c0_i32_3 = arith.constant 0 : i32
    %8 = vector.broadcast %c0_i32_3 : i32 to vector<32x128xi32>
    %9 = arith.cmpi ne, %7, %8 : vector<32x128xi32>
    %c0_i32_4 = arith.constant 0 : i32
    %10 = vector.broadcast %c0_i32_4 : i32 to vector<32x128xi32>
    %11 = arith.cmpi slt, %7, %10 : vector<32x128xi32>
    %c0_i32_5 = arith.constant 0 : i32
    %12 = arith.cmpi slt, %5, %c0_i32_5 : i32
    %13 = vector.broadcast %12 : i1 to vector<32x128xi1>
    %14 = vector.broadcast %13 : vector<32x128xi1> to vector<32x128xi1>
    %15 = arith.xori %11, %14 : vector<32x128xi1>
    %16 = arith.andi %15, %9 : vector<32x128xi1>
    %17 = vector.broadcast %5 : i32 to vector<32x128xi32>
    %18 = arith.addi %7, %17 : vector<32x128xi32>
    %19 = arith.select %16, %18, %7 : vector<32x128xi1>, vector<32x128xi32>
    %20 = vector.extract_strided_slice %2 {offsets = [0, 0], sizes = [1, 128], strides = [1, 1]} : vector<32x128xbf16> to vector<1x128xbf16>
    %21 = vector.extract_strided_slice %0 {offsets = [0, 0], sizes = [31, 128], strides = [1, 1]} : vector<32x128xbf16> to vector<31x128xbf16>
    %22 = tpu.concatenate %20, %21 in 0 : vector<1x128xbf16>, vector<31x128xbf16> -> vector<32x128xbf16>
    %c0_i32_6 = arith.constant 0 : i32
    %23 = vector.broadcast %c0_i32_6 : i32 to vector<32x128xi32>
    %24 = arith.cmpi eq, %19, %23 : vector<32x128xi32>
    %25 = arith.select %24, %2, %22 : vector<32x128xi1>, vector<32x128xbf16>
    %26 = vector.extract_strided_slice %0 {offsets = [1, 0], sizes = [31, 128], strides = [1, 1]} : vector<32x128xbf16> to vector<31x128xbf16>
    %27 = vector.extract_strided_slice %2 {offsets = [0, 0], sizes = [1, 128], strides = [1, 1]} : vector<32x128xbf16> to vector<1x128xbf16>
    %28 = tpu.concatenate %26, %27 in 0 : vector<31x128xbf16>, vector<1x128xbf16> -> vector<32x128xbf16>
    %c15_i32 = arith.constant 15 : i32
    %29 = vector.broadcast %c15_i32 : i32 to vector<32x128xi32>
    %30 = arith.cmpi eq, %19, %29 : vector<32x128xi32>
    %31 = arith.select %30, %2, %28 : vector<32x128xi1>, vector<32x128xbf16>
    %32 = tpu.concatenate %25, %0, %31 in 1 : vector<32x128xbf16>, vector<32x128xbf16>, vector<32x128xbf16> -> vector<32x384xbf16>
    %c0_7 = arith.constant 0 : index
    %c0_8 = arith.constant 0 : index
    %33 = vector.load %arg1[%c0_7, %c0_8] : memref<384x128xbf16, #tpu.memory_space<vmem>>, vector<384x128xbf16>
    %cst_9 = arith.constant dense<0.000000e+00> : vector<32x128xf32>
    %34 = tpu.matmul %32, %33, %cst_9 {dimension_numbers = #tpu.dot_dimension_numbers<[1], [0], [0], [1], [0, 0, 1, 1], [], []>} : vector<32x384xbf16>, vector<384x128xbf16>, vector<32x128xf32> -> vector<32x128xf32>
    %cst_10 = arith.constant dense<0.000000e+00> : vector<128xf32>
    %35 = vector.multi_reduction <add>, %34, %cst_10 [0] : vector<32x128xf32> to vector<128xf32>
    %36 = vector.shape_cast %35 : vector<128xf32> to vector<1x128xf32>
    %37 = arith.mulf %34, %34 : vector<32x128xf32>
    %cst_11 = arith.constant dense<0.000000e+00> : vector<128xf32>
    %38 = vector.multi_reduction <add>, %37, %cst_11 [0] : vector<32x128xf32> to vector<128xf32>
    %39 = vector.shape_cast %38 : vector<128xf32> to vector<1x128xf32>
    %40 = tpu.concatenate %36, %39 in 0 : vector<1x128xf32>, vector<1x128xf32> -> vector<2x128xf32>
    %c0_12 = arith.constant 0 : index
    %c0_13 = arith.constant 0 : index
    %41 = vector.load %arg5[%c0_12, %c0_13] : memref<128x8xf32, #tpu.memory_space<vmem>>, vector<128x8xf32>
    %cst_14 = arith.constant dense<0.000000e+00> : vector<2x8xf32>
    %42 = tpu.matmul %40, %41, %cst_14 {dimension_numbers = #tpu.dot_dimension_numbers<[1], [0], [0], [1], [0, 0, 1, 1], [], []>} : vector<2x128xf32>, vector<128x8xf32>, vector<2x8xf32> -> vector<2x8xf32>
    %cst_15 = arith.constant 0.001953125 : f32
    %43 = vector.broadcast %cst_15 : f32 to vector<2x8xf32>
    %44 = arith.mulf %42, %43 : vector<2x8xf32>
    %45 = vector.extract_strided_slice %44 {offsets = [0, 0], sizes = [1, 8], strides = [1, 1]} : vector<2x8xf32> to vector<1x8xf32>
    %46 = vector.extract_strided_slice %44 {offsets = [1, 0], sizes = [1, 8], strides = [1, 1]} : vector<2x8xf32> to vector<1x8xf32>
    %47 = arith.mulf %45, %45 : vector<1x8xf32>
    %48 = arith.subf %46, %47 : vector<1x8xf32>
    %cst_16 = arith.constant 0.000000e+00 : f32
    %49 = vector.broadcast %cst_16 : f32 to vector<1x8xf32>
    %50 = arith.maximumf %48, %49 : vector<1x8xf32>
    %51 = vector.extract_strided_slice %1 {offsets = [0, 0], sizes = [1, 8], strides = [1, 1]} : vector<2x8xf32> to vector<1x8xf32>
    %52 = vector.extract_strided_slice %1 {offsets = [1, 0], sizes = [1, 8], strides = [1, 1]} : vector<2x8xf32> to vector<1x8xf32>
    %cst_17 = arith.constant 9.99999974E-6 : f32
    %53 = vector.broadcast %cst_17 : f32 to vector<1x8xf32>
    %54 = arith.addf %50, %53 : vector<1x8xf32>
    %55 = math.rsqrt %54 : vector<1x8xf32>
    %56 = arith.mulf %51, %55 : vector<1x8xf32>
    %57 = arith.mulf %45, %56 : vector<1x8xf32>
    %58 = arith.subf %52, %57 : vector<1x8xf32>
    %59 = tpu.concatenate %56, %58 in 0 : vector<1x8xf32>, vector<1x8xf32> -> vector<2x8xf32>
    %c0_18 = arith.constant 0 : index
    %c0_19 = arith.constant 0 : index
    %60 = vector.load %arg6[%c0_18, %c0_19] : memref<8x128xf32, #tpu.memory_space<vmem>>, vector<8x128xf32>
    %cst_20 = arith.constant dense<0.000000e+00> : vector<2x128xf32>
    %61 = tpu.matmul %59, %60, %cst_20 {dimension_numbers = #tpu.dot_dimension_numbers<[1], [0], [0], [1], [0, 0, 1, 1], [], []>} : vector<2x8xf32>, vector<8x128xf32>, vector<2x128xf32> -> vector<2x128xf32>
    %62 = vector.extract_strided_slice %61 {offsets = [0, 0], sizes = [1, 128], strides = [1, 1]} : vector<2x128xf32> to vector<1x128xf32>
    %63 = vector.broadcast %62 : vector<1x128xf32> to vector<32x128xf32>
    %64 = arith.mulf %34, %63 : vector<32x128xf32>
    %65 = vector.extract_strided_slice %61 {offsets = [1, 0], sizes = [1, 128], strides = [1, 1]} : vector<2x128xf32> to vector<1x128xf32>
    %66 = vector.broadcast %65 : vector<1x128xf32> to vector<32x128xf32>
    %67 = arith.addf %64, %66 : vector<32x128xf32>
    %cst_21 = arith.constant 0.000000e+00 : f32
    %68 = vector.broadcast %cst_21 : f32 to vector<32x128xf32>
    %69 = arith.maximumf %67, %68 : vector<32x128xf32>
    %70 = arith.truncf %69 : vector<32x128xf32> to vector<32x128xbf16>
    %c0_22 = arith.constant 0 : index
    %c0_23 = arith.constant 0 : index
    %71 = vector.load %arg4[%c0_22, %c0_23] : memref<2x8xf32, #tpu.memory_space<vmem>>, vector<2x8xf32>
    %cst_24 = arith.constant 0.000000e+00 : bf16
    %72 = vector.broadcast %cst_24 : bf16 to vector<32x128xbf16>
    %73 = tpu.iota {dimensions = array<i32: 0>} : vector<32x128xi32>
    %c16_i32_25 = arith.constant 16 : i32
    %c0_i32_26 = arith.constant 0 : i32
    %74 = arith.cmpi eq, %c16_i32_25, %c0_i32_26 : i32
    %c1_i32_27 = arith.constant 1 : i32
    %75 = arith.select %74, %c1_i32_27, %c16_i32_25 : i32
    %76 = vector.broadcast %75 : i32 to vector<32x128xi32>
    %77 = arith.remsi %73, %76 : vector<32x128xi32>
    %c0_i32_28 = arith.constant 0 : i32
    %78 = vector.broadcast %c0_i32_28 : i32 to vector<32x128xi32>
    %79 = arith.cmpi ne, %77, %78 : vector<32x128xi32>
    %c0_i32_29 = arith.constant 0 : i32
    %80 = vector.broadcast %c0_i32_29 : i32 to vector<32x128xi32>
    %81 = arith.cmpi slt, %77, %80 : vector<32x128xi32>
    %c0_i32_30 = arith.constant 0 : i32
    %82 = arith.cmpi slt, %75, %c0_i32_30 : i32
    %83 = vector.broadcast %82 : i1 to vector<32x128xi1>
    %84 = vector.broadcast %83 : vector<32x128xi1> to vector<32x128xi1>
    %85 = arith.xori %81, %84 : vector<32x128xi1>
    %86 = arith.andi %85, %79 : vector<32x128xi1>
    %87 = vector.broadcast %75 : i32 to vector<32x128xi32>
    %88 = arith.addi %77, %87 : vector<32x128xi32>
    %89 = arith.select %86, %88, %77 : vector<32x128xi1>, vector<32x128xi32>
    %90 = vector.extract_strided_slice %72 {offsets = [0, 0], sizes = [1, 128], strides = [1, 1]} : vector<32x128xbf16> to vector<1x128xbf16>
    %91 = vector.extract_strided_slice %70 {offsets = [0, 0], sizes = [31, 128], strides = [1, 1]} : vector<32x128xbf16> to vector<31x128xbf16>
    %92 = tpu.concatenate %90, %91 in 0 : vector<1x128xbf16>, vector<31x128xbf16> -> vector<32x128xbf16>
    %c0_i32_31 = arith.constant 0 : i32
    %93 = vector.broadcast %c0_i32_31 : i32 to vector<32x128xi32>
    %94 = arith.cmpi eq, %89, %93 : vector<32x128xi32>
    %95 = arith.select %94, %72, %92 : vector<32x128xi1>, vector<32x128xbf16>
    %96 = vector.extract_strided_slice %70 {offsets = [1, 0], sizes = [31, 128], strides = [1, 1]} : vector<32x128xbf16> to vector<31x128xbf16>
    %97 = vector.extract_strided_slice %72 {offsets = [0, 0], sizes = [1, 128], strides = [1, 1]} : vector<32x128xbf16> to vector<1x128xbf16>
    %98 = tpu.concatenate %96, %97 in 0 : vector<31x128xbf16>, vector<1x128xbf16> -> vector<32x128xbf16>
    %c15_i32_32 = arith.constant 15 : i32
    %99 = vector.broadcast %c15_i32_32 : i32 to vector<32x128xi32>
    %100 = arith.cmpi eq, %89, %99 : vector<32x128xi32>
    %101 = arith.select %100, %72, %98 : vector<32x128xi1>, vector<32x128xbf16>
    %102 = tpu.concatenate %95, %70, %101 in 1 : vector<32x128xbf16>, vector<32x128xbf16>, vector<32x128xbf16> -> vector<32x384xbf16>
    %c0_33 = arith.constant 0 : index
    %c0_34 = arith.constant 0 : index
    %103 = vector.load %arg2[%c0_33, %c0_34] : memref<384x128xbf16, #tpu.memory_space<vmem>>, vector<384x128xbf16>
    %cst_35 = arith.constant dense<0.000000e+00> : vector<32x128xf32>
    %104 = tpu.matmul %102, %103, %cst_35 {dimension_numbers = #tpu.dot_dimension_numbers<[1], [0], [0], [1], [0, 0, 1, 1], [], []>} : vector<32x384xbf16>, vector<384x128xbf16>, vector<32x128xf32> -> vector<32x128xf32>
    %cst_36 = arith.constant dense<0.000000e+00> : vector<128xf32>
    %105 = vector.multi_reduction <add>, %104, %cst_36 [0] : vector<32x128xf32> to vector<128xf32>
    %106 = vector.shape_cast %105 : vector<128xf32> to vector<1x128xf32>
    %107 = arith.mulf %104, %104 : vector<32x128xf32>
    %cst_37 = arith.constant dense<0.000000e+00> : vector<128xf32>
    %108 = vector.multi_reduction <add>, %107, %cst_37 [0] : vector<32x128xf32> to vector<128xf32>
    %109 = vector.shape_cast %108 : vector<128xf32> to vector<1x128xf32>
    %110 = tpu.concatenate %106, %109 in 0 : vector<1x128xf32>, vector<1x128xf32> -> vector<2x128xf32>
    %c0_38 = arith.constant 0 : index
    %c0_39 = arith.constant 0 : index
    %111 = vector.load %arg5[%c0_38, %c0_39] : memref<128x8xf32, #tpu.memory_space<vmem>>, vector<128x8xf32>
    %cst_40 = arith.constant dense<0.000000e+00> : vector<2x8xf32>
    %112 = tpu.matmul %110, %111, %cst_40 {dimension_numbers = #tpu.dot_dimension_numbers<[1], [0], [0], [1], [0, 0, 1, 1], [], []>} : vector<2x128xf32>, vector<128x8xf32>, vector<2x8xf32> -> vector<2x8xf32>
    %cst_41 = arith.constant 0.001953125 : f32
    %113 = vector.broadcast %cst_41 : f32 to vector<2x8xf32>
    %114 = arith.mulf %112, %113 : vector<2x8xf32>
    %115 = vector.extract_strided_slice %114 {offsets = [0, 0], sizes = [1, 8], strides = [1, 1]} : vector<2x8xf32> to vector<1x8xf32>
    %116 = vector.extract_strided_slice %114 {offsets = [1, 0], sizes = [1, 8], strides = [1, 1]} : vector<2x8xf32> to vector<1x8xf32>
    %117 = arith.mulf %115, %115 : vector<1x8xf32>
    %118 = arith.subf %116, %117 : vector<1x8xf32>
    %cst_42 = arith.constant 0.000000e+00 : f32
    %119 = vector.broadcast %cst_42 : f32 to vector<1x8xf32>
    %120 = arith.maximumf %118, %119 : vector<1x8xf32>
    %121 = vector.extract_strided_slice %71 {offsets = [0, 0], sizes = [1, 8], strides = [1, 1]} : vector<2x8xf32> to vector<1x8xf32>
    %122 = vector.extract_strided_slice %71 {offsets = [1, 0], sizes = [1, 8], strides = [1, 1]} : vector<2x8xf32> to vector<1x8xf32>
    %cst_43 = arith.constant 9.99999974E-6 : f32
    %123 = vector.broadcast %cst_43 : f32 to vector<1x8xf32>
    %124 = arith.addf %120, %123 : vector<1x8xf32>
    %125 = math.rsqrt %124 : vector<1x8xf32>
    %126 = arith.mulf %121, %125 : vector<1x8xf32>
    %127 = arith.mulf %115, %126 : vector<1x8xf32>
    %128 = arith.subf %122, %127 : vector<1x8xf32>
    %129 = tpu.concatenate %126, %128 in 0 : vector<1x8xf32>, vector<1x8xf32> -> vector<2x8xf32>
    %c0_44 = arith.constant 0 : index
    %c0_45 = arith.constant 0 : index
    %130 = vector.load %arg6[%c0_44, %c0_45] : memref<8x128xf32, #tpu.memory_space<vmem>>, vector<8x128xf32>
    %cst_46 = arith.constant dense<0.000000e+00> : vector<2x128xf32>
    %131 = tpu.matmul %129, %130, %cst_46 {dimension_numbers = #tpu.dot_dimension_numbers<[1], [0], [0], [1], [0, 0, 1, 1], [], []>} : vector<2x8xf32>, vector<8x128xf32>, vector<2x128xf32> -> vector<2x128xf32>
    %132 = vector.extract_strided_slice %131 {offsets = [0, 0], sizes = [1, 128], strides = [1, 1]} : vector<2x128xf32> to vector<1x128xf32>
    %133 = vector.broadcast %132 : vector<1x128xf32> to vector<32x128xf32>
    %134 = arith.mulf %104, %133 : vector<32x128xf32>
    %135 = vector.extract_strided_slice %131 {offsets = [1, 0], sizes = [1, 128], strides = [1, 1]} : vector<2x128xf32> to vector<1x128xf32>
    %136 = vector.broadcast %135 : vector<1x128xf32> to vector<32x128xf32>
    %137 = arith.addf %134, %136 : vector<32x128xf32>
    %cst_47 = arith.constant 0.000000e+00 : f32
    %138 = vector.broadcast %cst_47 : f32 to vector<32x128xf32>
    %139 = arith.maximumf %137, %138 : vector<32x128xf32>
    %c0_48 = arith.constant 0 : index
    %c0_49 = arith.constant 0 : index
    %140 = vector.load %arg7[%c0_48, %c0_49] : memref<32x128xf32, #tpu.memory_space<vmem>>, vector<32x128xf32>
    tpu.vector_store %arg7[%c0_48, %c0_49], %139 {strides = array<i32>} : memref<32x128xf32, #tpu.memory_space<vmem>>, vector<32x128xf32>,
    return
  }
}

</mosaic_0001>

<bundles_post_ra>
// kernel: tile.9
= control target key start
LH: loop header
LB: loop body
LE: loop exit
PB: predicated region body
PF: predicated region fallthrough
CT: control target
= control target key end

     0   :  { %vm6_vm0 = vcmask 1043458   ;;  %vm10_vm1 = vcmask 1045508   ;;  %vm14_vm2 = vcmask 1047558   ;;  %s19_s6 = smov 3  ;;  %s22_s7 = smov 12  ;;  %vm16_vm3 = vcmask 64512   ;;  %s736_s0 = inlined_call_operand.vmem [shape: f32[16,8,8], index: 0, kind: input, shape index: {}]   ;;  %s737_s1 = inlined_call_operand.vmem [shape: f32[128,8], index: 1, kind: output, shape index: {}]  }
   0x1   :  { %v348_v0 = vld [vmem:[%s736_s0 + $0xf] ss:$16 sm:%s19_s6]   ;;  %s27_s12 = smov 48  ;;  %s32_s13 = smov 192  ;;  %vm38_vm4 = vcmask 1048512   ;;  %vm60_vm5 = vcmask 982912  }
   0x2   :  { %v349_v1 = vld [vmem:[%s736_s0 + $0xf] ss:$16 sm:%s22_s7]   ;;  %s63_s18 = smov 3  ;;  %s66_s21 = smov 12  ;;  %vm82_vm6 = vcmask 917312   ;;  %vm104_vm7 = vcmask 851712  }
   0x3   :  { %v25_v2 = vsel %vm6_vm0, %v349_v1, %v348_v0  ;;  %v350_v3 = vld [vmem:[%s736_s0 + $0xf] ss:$16 sm:%s27_s12]   ;;  %v356_v6 = vld [vmem:[%s736_s0 + $0xd] ss:$16 sm:%s63_s18]   ;;  %s71_s22 = smov 48  ;;  %s76_s27 = smov 192 }
   0x4   :  { %v351_v4 = vld [vmem:[%s736_s0 + $0xf] ss:$16 sm:%s32_s13]   ;;  %v30_v5 = vsel %vm10_vm1, %v350_v3, %v25_v2  ;;  %v357_v8 = vld [vmem:[%s736_s0 + $0xd] ss:$16 sm:%s66_s21]   ;;  %s423_s28 = smov 120   ;;  %s41_s2 = smov 3 }
   0x5   :  { %v35_v7 = vsel %vm14_vm2, %v351_v4, %v30_v5  ;;  %v358_v9 = vld [vmem:[%s736_s0 + $0xd] ss:$16 sm:%s71_s22]   ;;  %v69_v10 = vsel %vm6_vm0, %v357_v8, %v356_v6  ;;  %s44_s3 = smov 12  ;;  %v352_v13 = vld [vmem:[%s736_s0 + $0xe] ss:$16 sm:%s41_s2]   ;;  %s49_s8 = smov 48 }
   0x6   :  { %36 = vrot.lane.b32.xlu0 %v35_v7, %s423_s28  ;;  %v359_v11 = vld [vmem:[%s736_s0 + $0xd] ss:$16 sm:%s76_s27]   ;;  %v74_v12 = vsel %vm10_vm1, %v358_v9, %v69_v10  ;;  %s54_s9 = smov 192  ;;  %s85_s14 = smov 3  ;;  %vm126_vm8 = vcmask 786112   ;;  %vm148_vm9 = vcmask 720512  }
   0x7   :  { %v353_v14 = vld [vmem:[%s736_s0 + $0xe] ss:$16 sm:%s44_s3]   ;;  %v79_v15 = vsel %vm14_vm2, %v359_v11, %v74_v12  ;;  %s424_s15 = smov 104   ;;  %v360_v20 = vld [vmem:[%s736_s0 + $0xc] ss:$16 sm:%s85_s14]   ;;  %s88_s18 = smov 12 }
   0x8   :  { %v47_v16 = vsel %vm6_vm0, %v353_v14, %v352_v13  ;;  %v354_v17 = vld [vmem:[%s736_s0 + $0xe] ss:$16 sm:%s49_s8]   ;;  %80 = vrot.lane.b32.xlu1 %v79_v15, %s424_s15  ;;  %s93_s19 = smov 48  ;;  %s98_s24 = smov 192  ;;  %vm170_vm10 = vcmask 654912   ;;  %vm192_vm11 = vcmask 589312  }
   0x9   :  { %v355_v18 = vld [vmem:[%s736_s0 + $0xe] ss:$16 sm:%s54_s9]   ;;  %v52_v19 = vsel %vm10_vm1, %v354_v17, %v47_v16  ;;  %v361_v22 = vld [vmem:[%s736_s0 + $0xc] ss:$16 sm:%s88_s18]   ;;  %s425_s25 = smov 112   ;;  %s107_s28 = smov 3 }
   0xa   :  { %v57_v21 = vsel %vm14_vm2, %v355_v18, %v52_v19  ;;  %v362_v23 = vld [vmem:[%s736_s0 + $0xc] ss:$16 sm:%s93_s19]   ;;  %v91_v24 = vsel %vm6_vm0, %v361_v22, %v360_v20  ;;  %s110_s29 = smov 12  ;;  %v364_v27 = vld [vmem:[%s736_s0 + $0xb] ss:$16 sm:%s107_s28]   ;;  %s115_s5 = smov 48 }
   0xb   :  { %58 = vrot.lane.b32.xlu0 %v57_v21, %s425_s25  ;;  %v363_v25 = vld [vmem:[%s736_s0 + $0xc] ss:$16 sm:%s98_s24]   ;;  %v96_v26 = vsel %vm10_vm1, %v362_v23, %v91_v24  ;;  %s120_s6 = smov 192  ;;  %s129_s11 = smov 3  ;;  %vm214_vm12 = vcmask 523712   ;;  %vm236_vm13 = vcmask 458112  }
   0xc   :  { %v365_v28 = vld [vmem:[%s736_s0 + $0xb] ss:$16 sm:%s110_s29]   ;;  %v101_v29 = vsel %vm14_vm2, %v363_v25, %v96_v26  ;;  %s426_s12 = smov 96   ;;  %v368_v34 = vld [vmem:[%s736_s0 + $0xa] ss:$16 sm:%s129_s11]   ;;  %s132_s15 = smov 12 }
   0xd   :  { %v113_v30 = vsel %vm6_vm0, %v365_v28, %v364_v27  ;;  %v366_v31 = vld [vmem:[%s736_s0 + $0xb] ss:$16 sm:%s115_s5]   ;;  %102 = vrot.lane.b32.xlu1 %v101_v29, %s426_s12  ;;  %s137_s16 = smov 48  ;;  %s142_s21 = smov 192  ;;  %vm258_vm14 = vcmask 392512   ;;  %vm280_vm15 = vcmask 326912  }
   0xe   :  { %v367_v32 = vld [vmem:[%s736_s0 + $0xb] ss:$16 sm:%s120_s6]   ;;  %v118_v33 = vsel %vm10_vm1, %v366_v31, %v113_v30  ;;  %v369_v36 = vld [vmem:[%s736_s0 + $0xa] ss:$16 sm:%s132_s15]   ;;  %s427_s22 = smov 88   ;;  %s151_s25 = smov 3 }
   0xf   :  { %v123_v35 = vsel %vm14_vm2, %v367_v32, %v118_v33  ;;  %v370_v37 = vld [vmem:[%s736_s0 + $0xa] ss:$16 sm:%s137_s16]   ;;  %v135_v38 = vsel %vm6_vm0, %v369_v36, %v368_v34  ;;  %s154_s26 = smov 12  ;;  %v372_v41 = vld [vmem:[%s736_s0 + $0x9] ss:$16 sm:%s151_s25]   ;;  %s159_s2 = smov 48 }
  0x10   :  { %124 = vrot.lane.b32.xlu0 %v123_v35, %s427_s22  ;;  %v371_v39 = vld [vmem:[%s736_s0 + $0xa] ss:$16 sm:%s142_s21]   ;;  %v140_v40 = vsel %vm10_vm1, %v370_v37, %v135_v38  ;;  %s164_s3 = smov 192  ;;  %s173_s8 = smov 3 }
  0x11   :  { %v373_v42 = vld [vmem:[%s736_s0 + $0x9] ss:$16 sm:%s154_s26]   ;;  %v145_v43 = vsel %vm14_vm2, %v371_v39, %v140_v40  ;;  %s428_s9 = smov 80   ;;  %v376_v48 = vld [vmem:[%s736_s0 + $0x8] ss:$16 sm:%s173_s8]   ;;  %s176_s12 = smov 12 }
  0x12   :  { %v157_v44 = vsel %vm6_vm0, %v373_v42, %v372_v41  ;;  %v374_v45 = vld [vmem:[%s736_s0 + $0x9] ss:$16 sm:%s159_s2]   ;;  %146 = vrot.lane.b32.xlu1 %v145_v43, %s428_s9  ;;  %s181_s13 = smov 48  ;;  %s186_s18 = smov 192 }
  0x13   :  { %v375_v46 = vld [vmem:[%s736_s0 + $0x9] ss:$16 sm:%s164_s3]   ;;  %v162_v47 = vsel %vm10_vm1, %v374_v45, %v157_v44  ;;  %v377_v50 = vld [vmem:[%s736_s0 + $0x8] ss:$16 sm:%s176_s12]   ;;  %s429_s19 = smov 72   ;;  %s195_s22 = smov 3 }
  0x14   :  { %v167_v49 = vsel %vm14_vm2, %v375_v46, %v162_v47  ;;  %v378_v51 = vld [vmem:[%s736_s0 + $0x8] ss:$16 sm:%s181_s13]   ;;  %v179_v52 = vsel %vm6_vm0, %v377_v50, %v376_v48  ;;  %s198_s23 = smov 12  ;;  %v380_v55 = vld [vmem:[%s736_s0 + $0x7] ss:$16 sm:%s195_s22]   ;;  %s203_s28 = smov 48 }
  0x15   :  { %168 = vrot.lane.b32.xlu0 %v167_v49, %s429_s19  ;;  %v379_v53 = vld [vmem:[%s736_s0 + $0x8] ss:$16 sm:%s186_s18]   ;;  %v184_v54 = vsel %vm10_vm1, %v378_v51, %v179_v52  ;;  %s208_s29 = smov 192  ;;  %s217_s5 = smov 3 }
  0x16   :  { %v381_v56 = vld [vmem:[%s736_s0 + $0x7] ss:$16 sm:%s198_s23]   ;;  %v189_v57 = vsel %vm14_vm2, %v379_v53, %v184_v54  ;;  %s430_s6 = smov 64   ;;  %v384_v62 = vld [vmem:[%s736_s0 + $0x6] ss:$16 sm:%s217_s5]   ;;  %s220_s9 = smov 12 }
  0x17   :  { %v201_v58 = vsel %vm6_vm0, %v381_v56, %v380_v55  ;;  %v382_v59 = vld [vmem:[%s736_s0 + $0x7] ss:$16 sm:%s203_s28]   ;;  %190 = vrot.lane.b32.xlu1 %v189_v57, %s430_s6  ;;  %s225_s10 = smov 48  ;;  %s230_s15 = smov 192 }
  0x18   :  { %v383_v60 = vld [vmem:[%s736_s0 + $0x7] ss:$16 sm:%s208_s29]   ;;  %v206_v61 = vsel %vm10_vm1, %v382_v59, %v201_v58  ;;  %v385_v0 = vld [vmem:[%s736_s0 + $0x6] ss:$16 sm:%s220_s9]   ;;  %s431_s16 = smov 56   ;;  %s239_s19 = smov 3 }
  0x19   :  { %v211_v63 = vsel %vm14_vm2, %v383_v60, %v206_v61  ;;  %v386_v1 = vld [vmem:[%s736_s0 + $0x6] ss:$16 sm:%s225_s10]   ;;  %v223_v2 = vsel %vm6_vm0, %v385_v0, %v384_v62  ;;  %s242_s20 = smov 12  ;;  %v388_v5 = vld [vmem:[%s736_s0 + $0x5] ss:$16 sm:%s239_s19]   ;;  %s247_s25 = smov 48 }
  0x1a   :  { %212 = vrot.lane.b32.xlu0 %v211_v63, %s431_s16  ;;  %v387_v3 = vld [vmem:[%s736_s0 + $0x6] ss:$16 sm:%s230_s15]   ;;  %v228_v4 = vsel %vm10_vm1, %v386_v1, %v223_v2  ;;  %s252_s26 = smov 192  ;;  %s261_s2 = smov 3 }
  0x1b   :  { %v389_v6 = vld [vmem:[%s736_s0 + $0x5] ss:$16 sm:%s242_s20]   ;;  %v233_v7 = vsel %vm14_vm2, %v387_v3, %v228_v4  ;;  %s432_s3 = smov 48   ;;  %v392_v12 = vld [vmem:[%s736_s0 + $0x4] ss:$16 sm:%s261_s2]   ;;  %s264_s6 = smov 12 }
  0x1c   :  { %v245_v8 = vsel %vm6_vm0, %v389_v6, %v388_v5  ;;  %v390_v9 = vld [vmem:[%s736_s0 + $0x5] ss:$16 sm:%s247_s25]   ;;  %234 = vrot.lane.b32.xlu1 %v233_v7, %s432_s3  ;;  %s269_s7 = smov 48  ;;  %s274_s12 = smov 192 }
  0x1d   :  { %v391_v10 = vld [vmem:[%s736_s0 + $0x5] ss:$16 sm:%s252_s26]   ;;  %v250_v11 = vsel %vm10_vm1, %v390_v9, %v245_v8  ;;  %v393_v14 = vld [vmem:[%s736_s0 + $0x4] ss:$16 sm:%s264_s6]   ;;  %s433_s13 = smov 40   ;;  %s283_s16 = smov 3 }
  0x1e   :  { %v255_v13 = vsel %vm14_vm2, %v391_v10, %v250_v11  ;;  %v394_v15 = vld [vmem:[%s736_s0 + $0x4] ss:$16 sm:%s269_s7]   ;;  %v267_v16 = vsel %vm6_vm0, %v393_v14, %v392_v12  ;;  %s286_s17 = smov 12  ;;  %v396_v19 = vld [vmem:[%s736_s0 + $0x3] ss:$16 sm:%s283_s16]   ;;  %s291_s22 = smov 48 }
  0x1f   :  { %256 = vrot.lane.b32.xlu0 %v255_v13, %s433_s13  ;;  %v395_v17 = vld [vmem:[%s736_s0 + $0x4] ss:$16 sm:%s274_s12]   ;;  %v272_v18 = vsel %vm10_vm1, %v394_v15, %v267_v16  ;;  %s296_s23 = smov 192  ;;  %s305_s28 = smov 3 }
  0x20   :  { %v397_v20 = vld [vmem:[%s736_s0 + $0x3] ss:$16 sm:%s286_s17]   ;;  %v277_v21 = vsel %vm14_vm2, %v395_v17, %v272_v18  ;;  %s434_s29 = smov 32   ;;  %v400_v26 = vld [vmem:[%s736_s0 + $0x2] ss:$16 sm:%s305_s28]   ;;  %s308_s3 = smov 12 }
  0x21   :  { %v289_v22 = vsel %vm6_vm0, %v397_v20, %v396_v19  ;;  %v398_v23 = vld [vmem:[%s736_s0 + $0x3] ss:$16 sm:%s291_s22]   ;;  %278 = vrot.lane.b32.xlu1 %v277_v21, %s434_s29  ;;  %s313_s4 = smov 48  ;;  %s318_s9 = smov 192 }
  0x22   :  { %v399_v24 = vld [vmem:[%s736_s0 + $0x3] ss:$16 sm:%s296_s23]   ;;  %v294_v25 = vsel %vm10_vm1, %v398_v23, %v289_v22  ;;  %v401_v28 = vld [vmem:[%s736_s0 + $0x2] ss:$16 sm:%s308_s3]   ;;  %s435_s10 = smov 24   ;;  %s327_s13 = smov 3 }
  0x23   :  { %v299_v27 = vsel %vm14_vm2, %v399_v24, %v294_v25  ;;  %v402_v29 = vld [vmem:[%s736_s0 + $0x2] ss:$16 sm:%s313_s4]   ;;  %v311_v30 = vsel %vm6_vm0, %v401_v28, %v400_v26  ;;  %s330_s14 = smov 12  ;;  %v404_v33 = vld [vmem:[%s736_s0 + $0x1] ss:$16 sm:%s327_s13]   ;;  %s335_s19 = smov 48 }
  0x24   :  { %300 = vrot.lane.b32.xlu0 %v299_v27, %s435_s10  ;;  %v403_v31 = vld [vmem:[%s736_s0 + $0x2] ss:$16 sm:%s318_s9]   ;;  %v316_v32 = vsel %vm10_vm1, %v402_v29, %v311_v30  ;;  %s340_s20 = smov 192  ;;  %s2_s25 = smov 3 }
  0x25   :  { %v405_v34 = vld [vmem:[%s736_s0 + $0x1] ss:$16 sm:%s330_s14]   ;;  %v321_v35 = vsel %vm14_vm2, %v403_v31, %v316_v32  ;;  %s436_s26 = smov 16   ;;  %s4_s27 = smov 12  ;;  %v3_v40 = vld [vmem:[%s736_s0] ss:$16 sm:%s2_s25]  }
  0x26   :  { %v333_v36 = vsel %vm6_vm0, %v405_v34, %v404_v33  ;;  %v406_v37 = vld [vmem:[%s736_s0 + $0x1] ss:$16 sm:%s335_s19]   ;;  %322 = vrot.lane.b32.xlu1 %v321_v35, %s436_s26  ;;  %s8_s28 = smov 48  ;;  %s12_s2 = smov 192 }
  0x27   :  { %v407_v38 = vld [vmem:[%s736_s0 + $0x1] ss:$16 sm:%s340_s20]   ;;  %v338_v39 = vsel %vm10_vm1, %v406_v37, %v333_v36  ;;  %v5_v42 = vld [vmem:[%s736_s0] ss:$16 sm:%s4_s27]   ;;  %s437_s7 = smov 8  }
  0x28   :  { %v343_v41 = vsel %vm14_vm2, %v407_v38, %v338_v39  ;;  %v9_v43 = vld [vmem:[%s736_s0] ss:$16 sm:%s8_s28]   ;;  %v7_v44 = vsel %vm6_vm0, %v5_v42, %v3_v40  ;;  %vm302_vm0 = vcmask 261312  }
  0x29   :  { %344 = vrot.lane.b32.xlu0 %v343_v41, %s437_s7  ;;  %v13_v45 = vld [vmem:[%s736_s0] ss:$16 sm:%s12_s2]   ;;  %v11_v46 = vsel %vm10_vm1, %v9_v43, %v7_v44  ;;  %vm324_vm1 = vcmask 195712  }
  0x2a   :  { %v15_v47 = vsel %vm14_vm2, %v13_v45, %v11_v46  ;;  %vm346_vm2 = vcmask 130112  }
  0x2b   :  { %17 = vst.msk [vmem:[%s737_s1] sm:$0xff] %vm16_vm3, %v15_v47  }
  0x78   :  { %v37_v48 = vpop.permute.xlu0 %36  }
  0x79   :  { %39 = vst.msk [vmem:[%s737_s1] sm:$0xff] %vm38_vm4, %v37_v48  }
  0x7a   :  { %v81_v49 = vpop.permute.xlu1 %80  }
  0x7d   :  { %v59_v50 = vpop.permute.xlu0 %58  }
  0x7e   :  { %61 = vst.msk [vmem:[%s737_s1] sm:$0xff] %vm60_vm5, %v59_v50  }
  0x7f   :  { %83 = vst.msk [vmem:[%s737_s1] sm:$0xff] %vm82_vm6, %v81_v49   ;;  %v103_v51 = vpop.permute.xlu1 %102  }
  0x80   :  { %105 = vst.msk [vmem:[%s737_s1] sm:$0xff] %vm104_vm7, %v103_v51  }
  0x82   :  { %v125_v52 = vpop.permute.xlu0 %124  }
  0x83   :  { %127 = vst.msk [vmem:[%s737_s1] sm:$0xff] %vm126_vm8, %v125_v52  }
  0x84   :  { %v147_v53 = vpop.permute.xlu1 %146  }
  0x85   :  { %149 = vst.msk [vmem:[%s737_s1] sm:$0xff] %vm148_vm9, %v147_v53  }
  0x87   :  { %v169_v54 = vpop.permute.xlu0 %168  }
  0x88   :  { %171 = vst.msk [vmem:[%s737_s1] sm:$0xff] %vm170_vm10, %v169_v54  }
  0x89   :  { %v191_v55 = vpop.permute.xlu1 %190  }
  0x8a   :  { %193 = vst.msk [vmem:[%s737_s1] sm:$0xff] %vm192_vm11, %v191_v55  }
  0x8c   :  { %v213_v56 = vpop.permute.xlu0 %212  }
  0x8d   :  { %215 = vst.msk [vmem:[%s737_s1] sm:$0xff] %vm214_vm12, %v213_v56  }
  0x8e   :  { %v235_v57 = vpop.permute.xlu1 %234  }
  0x8f   :  { %237 = vst.msk [vmem:[%s737_s1] sm:$0xff] %vm236_vm13, %v235_v57  }
  0x91   :  { %v257_v58 = vpop.permute.xlu0 %256  }
  0x92   :  { %259 = vst.msk [vmem:[%s737_s1] sm:$0xff] %vm258_vm14, %v257_v58  }
  0x93   :  { %v279_v59 = vpop.permute.xlu1 %278  }
  0x94   :  { %281 = vst.msk [vmem:[%s737_s1] sm:$0xff] %vm280_vm15, %v279_v59  }
  0x96   :  { %v301_v60 = vpop.permute.xlu0 %300  }
  0x97   :  { %303 = vst.msk [vmem:[%s737_s1] sm:$0xff] %vm302_vm0, %v301_v60  }
  0x98   :  { %v323_v61 = vpop.permute.xlu1 %322  }
  0x99   :  { %325 = vst.msk [vmem:[%s737_s1] sm:$0xff] %vm324_vm1, %v323_v61  }
  0x9b   :  { %v345_v62 = vpop.permute.xlu0 %344  }
  0x9c   :  { %347 = vst.msk [vmem:[%s737_s1] sm:$0xff] %vm346_vm2, %v345_v62  }

// kernel: conv_block_forward.1
= control target key start
LH: loop header
LB: loop body
LE: loop exit
PB: predicated region body
PF: predicated region fallthrough
CT: control target
= control target key end

     0   :  { %v34_v9 = vlaneseq  ;;  %vm97_vm0 = vsmask.f32 256  ;;  %vm115_vm1 = vcmask 1040384   ;;  %vm148_vm5 = vcmask 1047552   ;;  %s2098_s1 = inlined_call_operand.vmem [shape: bf16[384,128], index: 1, kind: input, shape index: {}]   ;;  %s2099_s0 = inlined_call_operand.vmem [shape: bf16[32,128], index: 0, kind: input, shape index: {}]   ;;  %s2100_s5 = inlined_call_operand.vmem [shape: f32[128,8], index: 5, kind: input, shape index: {}]   ;;  %s2101_s6 = inlined_call_operand.vmem [shape: f32[8,128], index: 6, kind: input, shape index: {}]   ;;  %s2102_s2 = inlined_call_operand.vmem [shape: bf16[384,128], index: 2, kind: input, shape index: {}]   ;;  %s2103_s3 = inlined_call_operand.vmem [shape: f32[2,8], index: 3, kind: input, shape index: {}]   ;;  %s2104_s4 = inlined_call_operand.vmem [shape: f32[2,8], index: 4, kind: input, shape index: {}]   ;;  %s2105_s7 = inlined_call_operand.vmem [shape: f32[32,128], index: 7, kind: output, shape index: {}]  }
   0x1   :  { %v1587_v0 = vld [vmem:[%s2098_s1 + $0x40] sm:$0xff]   ;;  %v1590_v3 = vld [vmem:[%s2098_s1 + $0x48] sm:$0xff]   ;;  %v1593_v6 = vld [vmem:[%s2098_s1 + $0x50] sm:$0xff]   ;;  %vm140_vm7 = vsmask.f32 7424  ;;  %vm1641_vm8 = vmmov 0  }
   0x2   :  { %v1588_v1 = vld [vmem:[%s2098_s1] sm:$0xff]   ;;  %1301 = vmatprep.subr.bf16.mxu0 %v1587_v0  ;;  %v1591_v4 = vld [vmem:[%s2098_s1 + $0x8] sm:$0xff]   ;;  %v1594_v7 = vld [vmem:[%s2098_s1 + $0x10] sm:$0xff]   ;;  %v1724_v14 = vshrl.u32 %v34_v9, 7  ;;  %v1642_v40 = vmov 0  }
   0x3   :  { %v1589_v2 = vld [vmem:[%s2098_s1 + $0x80] sm:$0xff]   ;;  %1302 = vmatpush3.bf16.msra.mxu0 %v1588_v1  ;;  %v1592_v5 = vld [vmem:[%s2098_s1 + $0x88] sm:$0xff]   ;;  %v1595_v8 = vld [vmem:[%s2098_s1 + $0x90] sm:$0xff]  }
   0x4   :  { %1415 = vmatprep.subr.bf16.mxu1 %v1589_v2  ;;  %1303 = vmatprep.subr.bf16.mxu0 %v1590_v3  ;;  %v1596_v10 = vld [vmem:[%s2098_s1 + $0x58] sm:$0xff]   ;;  %v1599_v13 = vld [vmem:[%s2098_s1 + $0x60] sm:$0xff]   ;;  %v1602_v17 = vld [vmem:[%s2098_s1 + $0x68] sm:$0xff]   ;;  %v43_v18 = vand.u32 15, %v1724_v14  ;;  %v36_v19 = vadd.s32 8, %v1724_v14  ;;  %v38_v21 = vadd.s32 24, %v1724_v14 }
   0x5   :  { %1416 = vmatpush3.bf16.msra.mxu1 %v1589_v2  ;;  %v1597_v11 = vld [vmem:[%s2098_s1 + $0x18] sm:$0xff]   ;;  %v1601_v15 = vld [vmem:[%s2098_s1 + $0xa0] sm:$0xff]   ;;  %v1604_v20 = vld [vmem:[%s2098_s1 + $0xa8] sm:$0xff]   ;;  %v37_v23 = vadd.s32 16, %v1724_v14 }
   0x6   :  { %1417 = vmatprep.subr.bf16.mxu1 %v1592_v5  ;;  %v1598_v12 = vld [vmem:[%s2098_s1 + $0x98] sm:$0xff]   ;;  %v1600_v16 = vld [vmem:[%s2098_s1 + $0x20] sm:$0xff]   ;;  %v1603_v22 = vld [vmem:[%s2098_s1 + $0x28] sm:$0xff]   ;;  %vm1748_vm2 = vcmp.eq.s32.totalorder %v43_v18, 0  ;;  %v50_v27 = vand.u32 15, %v36_v19  ;;  %v64_v29 = vand.u32 15, %v38_v21 }
   0x7   :  { %1304 = vmatpush3.bf16.msra.mxu0 %v1591_v4  ;;  %v1605_v24 = vld [vmem:[%s2098_s1 + $0x70] sm:$0xff]   ;;  %v1608_v30 = vld [vmem:[%s2098_s1 + $0x78] sm:$0xff]   ;;  %v57_v31 = vand.u32 15, %v37_v23  ;;  %v1611_v32 = vld [vmem:[%s2099_s0] sm:$0xff]  }
   0x8   :  { %1305 = vmatprep.subr.bf16.mxu0 %v1593_v6  ;;  %v1606_v26 = vld [vmem:[%s2098_s1 + $0x30] sm:$0xff]   ;;  %vm1766_vm3 = vmand %vm115_vm1, %vm97_vm0  ;;  %vm1770_vm4 = vcmp.eq.s32.totalorder %v50_v27, 15  ;;  %v1610_v35 = vld [vmem:[%s2098_s1 + $0xb8] sm:$0xff]   ;;  %v99_v36 = vshrl.u32 %v1611_v32, 16  ;;  %399 = vmatprep.mubr.bf16.mxu0 %v1611_v32  ;;  %v102_v37 = vshll.u32 %v1611_v32, 16  ;;  %vm1788_vm10 = vcmp.eq.s32.totalorder %v64_v29, 15 }
   0x9   :  { %1418 = vmatpush3.bf16.msra.mxu1 %v1592_v5  ;;  %v1607_v28 = vld [vmem:[%s2098_s1 + $0xb0] sm:$0xff]   ;;  %vm122_vm6 = vmpackc.low %vm1748_vm2, %vm1748_vm2  ;;  %v1612_v38 = vld [vmem:[%s2099_s0 + $0x8] sm:$0xff]   ;;  %vm1792_vm11 = vcmp.eq.s32.totalorder %v57_v31, 0  ;;  %v1644_v32 = vmov 0.0  }
   0xa   :  { %1419 = vmatprep.subr.bf16.mxu1 %v1595_v8  ;;  %v1609_v39 = vld [vmem:[%s2098_s1 + $0x38] sm:$0xff]   ;;  %vm123_vm9 = vmpackc.low %vm1641_vm8, %vm1641_vm8  ;;  %v126_v41 = vsel %vm122_vm6, 65537, %v1642_v40  ;;  %v101_v44 = vrot.slane %v99_v36, 7  ;;  %v109_v46 = vshll.u32 %v1612_v38, 16  ;;  %v141_v47 = vrot.slane %v102_v37, 1  ;;  %v495_v18 = vld [vmem:[%s2100_s5 + $0x30] sm:$0xff] }
   0xb   :  { %1306 = vmatpush3.bf16.msra.mxu0 %v1594_v7  ;;  %v127_v45 = vsel %vm123_vm9, 65537, %v1642_v40  ;;  %vm156_vm12 = vmpackc.low %vm1770_vm4, %vm1770_vm4  ;;  %v106_v50 = vshrl.u32 %v1612_v38, 16  ;;  %v489_v7 = vld [vmem:[%s2100_s5] sm:$0xff]  ;;  %v496_v19 = vld [vmem:[%s2100_s5 + $0x38] sm:$0xff]  ;;  %vm595_vm9 = vcmask 64512  }
   0xc   :  { %1307 = vmatprep.subr.bf16.mxu0 %v1596_v10  ;;  %v1227_v48 = vcombine.low %v126_v41, %v127_v45  ;;  %v160_v49 = vsel %vm156_vm12, 65537, %v1642_v40  ;;  %vm1801_vm13 = vmand %vm148_vm5, %vm140_vm7  ;;  %v104_v52 = vor.u32 %v102_v37, %v101_v44  ;;  %v142_v53 = vor.u32 %v141_v47, %v99_v36  ;;  %v497_v21 = vld [vmem:[%s2100_s5 + $0x40] sm:$0xff]  ;;  %v500_v25 = vld [vmem:[%s2100_s5 + $0x58] sm:$0xff] }
   0xd   :  { %1420 = vmatpush3.bf16.msra.mxu1 %v1595_v8  ;;  %v143_v54 = vrot.slane %v109_v46, 1  ;;  %v1229_v55 = vcombine.low %v127_v45, %v160_v49  ;;  %vm158_vm14 = vmpackc.low %vm1788_vm10, %vm1788_vm10  ;;  %v108_v57 = vrot.slane %v106_v50, 7  ;;  %v490_v8 = vld [vmem:[%s2100_s5 + $0x8] sm:$0xff]  ;;  %v1643_v10 = vmov 0.0|0.0   ;;  %v501_v27 = vld [vmem:[%s2100_s5 + $0x60] sm:$0xff] }
   0xe   :  { %1421 = vmatprep.subr.bf16.mxu1 %v1598_v12  ;;  %vm1808_vm15 = vcmp.eq.s16.totalorder %v1227_v48, 0  ;;  %v162_v58 = vsel %vm158_vm14, 65537, %v1642_v40  ;;  %vm124_vm2 = vmpackc.low %vm1792_vm11, %vm1792_vm11  ;;  %v117_v59 = vsel %vm1766_vm3, 0, %v104_v52  ;;  %v1847_v9 = vpack.c.bf16 %v490_v8, %v489_v7  ;;  %v504_v31 = vld [vmem:[%s2100_s5 + $0x78] sm:$0xff] }
   0xf   :  { %1308 = vmatpush3.bf16.msra.mxu0 %v1597_v11  ;;  %v144_v60 = vsel %vm140_vm7, %v142_v53, %v143_v54  ;;  %vm1818_vm4 = vcmp.eq.s16.totalorder %v1229_v55, 0  ;;  %v145_v62 = vor.u32 %v143_v54, %v106_v50  ;;  %v1230_v63 = vcombine.low %v127_v45, %v162_v58  ;;  %v491_v11 = vld [vmem:[%s2100_s5 + $0x10] sm:$0xff] }
  0x10   :  { %1309 = vmatprep.subr.bf16.mxu0 %v1599_v13  ;;  %1431 = vmatprep.mubr.msk.bf16.mxu1 %vm1818_vm4, %v144_v60  ;;  %v128_v0 = vsel %vm124_vm2, 65537, %v1642_v40  ;;  %v111_v3 = vor.u32 %v109_v46, %v108_v57 }
  0x11   :  { %1422 = vmatpush3.bf16.msra.mxu1 %v1598_v12  ;;  %v150_v1 = vsel %vm1801_vm13, %v145_v62, 0  ;;  %vm1828_vm5 = vcmp.eq.s16.totalorder %v1230_v63, 0  ;;  %v1228_v4 = vcombine.low %v128_v0, %v127_v45  ;;  %v492_v12 = vld [vmem:[%s2100_s5 + $0x18] sm:$0xff] }
  0x12   :  { %1423 = vmatprep.subr.bf16.mxu1 %v1601_v15  ;;  %v112_v5 = vsel %vm97_vm0, %v101_v44, %v111_v3  ;;  %v1858_v13 = vpack.c.bf16 %v492_v12, %v491_v11 }
  0x13   :  { %1310 = vmatpush3.bf16.msra.mxu0 %v1600_v16  ;;  %vm1835_vm6 = vcmp.eq.s16.totalorder %v1228_v4, 0  ;;  %v494_v16 = vld [vmem:[%s2100_s5 + $0x28] sm:$0xff] }
  0x14   :  { %1311 = vmatprep.subr.bf16.mxu0 %v1602_v17 }
  0x15   :  { %1424 = vmatpush3.bf16.msra.mxu1 %v1601_v15  ;;  %v493_v15 = vld [vmem:[%s2100_s5 + $0x20] sm:$0xff] }
  0x16   :  { %1425 = vmatprep.subr.bf16.mxu1 %v1604_v20  ;;  %v1868_v17 = vpack.c.bf16 %v494_v16, %v493_v15 }
  0x17   :  { %1312 = vmatpush3.bf16.msra.mxu0 %v1603_v22  ;;  %v498_v22 = vld [vmem:[%s2100_s5 + $0x48] sm:$0xff] }
  0x18   :  { %1313 = vmatprep.subr.bf16.mxu0 %v1605_v24  ;;  %v1888_v23 = vpack.c.bf16 %v498_v22, %v497_v21  ;;  %v499_v24 = vld [vmem:[%s2100_s5 + $0x50] sm:$0xff] }
  0x19   :  { %1426 = vmatpush3.bf16.msra.mxu1 %v1604_v20  ;;  %v1878_v20 = vpack.c.bf16 %v496_v19, %v495_v18 }
  0x1a   :  { %1427 = vmatprep.subr.bf16.mxu1 %v1607_v28 }
  0x1b   :  { %1314 = vmatpush3.bf16.msra.mxu0 %v1606_v26  ;;  %v1898_v26 = vpack.c.bf16 %v500_v25, %v499_v24 }
  0x1c   :  { %1315 = vmatprep.subr.bf16.mxu0 %v1608_v30  ;;  %v503_v30 = vld [vmem:[%s2100_s5 + $0x70] sm:$0xff] }
  0x1d   :  { %1428 = vmatpush3.bf16.msra.mxu1 %v1607_v28  ;;  %v502_v28 = vld [vmem:[%s2100_s5 + $0x68] sm:$0xff]  ;;  %v1920_v34 = vpack.c.bf16 %v504_v31, %v503_v30  ;;  %v1615_v30 = vld [vmem:[%s2102_s2 + $0x80] sm:$0xff]  }
  0x1e   :  { %1429 = vmatprep.subr.bf16.mxu1 %v1610_v35  ;;  %v1908_v29 = vpack.c.bf16 %v502_v28, %v501_v27  ;;  %v1950_v27 = vld [vmem:[%s2101_s6] sm:$0xff]  ;;  %v1618_v31 = vld [vmem:[%s2102_s2 + $0x88] sm:$0xff]  }
  0x1f   :  { %1316 = vmatpush3.bf16.msra.mxu0 %v1609_v39  ;;  %v1613_v28 = vld [vmem:[%s2102_s2 + $0x40] sm:$0xff]  }
  0x20   :  { %1535 = vmatprep.subr.bf16.mxu0 %v1643_v10 }
  0x21   :  { %1430 = vmatpush3.bf16.msra.mxu1 %v1610_v35 }
  0x22   :  { %1256 = vmatmul.mubr.msk.bf16.vlgmr.msra.gmra.mrb[0].mxu0 %vm1808_vm15, %v117_v59  ;;  %1470 = vmatprep.subr.mxu1 %v1644_v32 }
  0x23   :  { %407 = vmatprep.mubr.bf16.mxu0 %v1612_v38  ;;  %1537 = vmatpush3.bf16.msra.mxu0 %v1847_v9 }
  0x24   :  { %1432 = vmatmul.mubr.msk.bf16.vlgmr.msra.gmra.mrb[0].mxu1 %vm1828_vm5, %v150_v1  ;;  %1538 = vmatprep.subr.bf16.mxu0 %v1643_v10 }
  0x25   :  { %1472 = vmatprep.mubr.msk.f32.mxu1 %vm1641_vm8, %v1644_v32  ;;  %1471 = vmatpush3.msra.mxu1 %v1950_v27 }
  0x26   :  { %1358 = vmatprep.subr.bf16.mxu1 %v1613_v28 }
  0x27   :  { %1540 = vmatpush3.bf16.msra.mxu0 %v1858_v13 }
  0x28   :  { %1541 = vmatprep.subr.bf16.mxu0 %v1643_v10 }
  0x2a   :  { %1258 = vmatmul.mubr.msk.bf16.gmra.mrb[4].mxu0 %vm1835_vm6, %v112_v5 }
  0x2b   :  { %1543 = vmatpush3.bf16.msra.mxu0 %v1868_v17  ;;  %1467 = vmatprep.mubr.msk.f32.mxu0 %vm1641_vm8, %v1644_v32 }
  0x2c   :  { %1544 = vmatprep.subr.bf16.mxu0 %v1643_v10 }
  0x2f   :  { %1546 = vmatpush3.bf16.msra.mxu0 %v1878_v20 }
  0x30   :  { %1547 = vmatprep.subr.bf16.mxu0 %v1643_v10 }
  0x33   :  { %1549 = vmatpush3.bf16.msra.mxu0 %v1888_v23 }
  0x34   :  { %1550 = vmatprep.subr.bf16.mxu0 %v1643_v10 }
  0x37   :  { %1552 = vmatpush3.bf16.msra.mxu0 %v1898_v26 }
  0x38   :  { %1553 = vmatprep.subr.bf16.mxu0 %v1643_v10 }
  0x3b   :  { %1555 = vmatpush3.bf16.msra.mxu0 %v1908_v29 }
  0x3c   :  { %1556 = vmatprep.subr.bf16.mxu0 %v1643_v10 }
  0x3f   :  { %1558 = vmatpush3.bf16.msra.mxu0 %v1920_v34 }
  0x40   :  { %1475 = vmatprep.subr.bf16.mxu0 %v1615_v30 }
  0xf5   :  { %v1317_v35 = vpop.f32.mrb[0].mxu0 }
  0xf6   :  { %v1318_v36 = vpop.f32.mrb[1].mxu0 }
  0xf7   :  { %v1319_v37 = vadd.f32 %v1318_v36, %v1317_v35  ;;  %v1320_v38 = vpop.f32.mrb[2].mxu0  ;;  %v1433_v39 = vpop.f32.mrb[0].mxu1  ;;  %v1621_v35 = vld [vmem:[%s2102_s2 + $0x90] sm:$0xff]   ;;  %v1624_v36 = vld [vmem:[%s2102_s2 + $0x98] sm:$0xff]  }
  0xf8   :  { %v1321_v40 = vpop.f32.mrb[3].mxu0  ;;  %v450_v41 = vpop.f32.mrb[1].mxu1 }
  0xf9   :  { %v1322_v42 = vadd.f32 %v1321_v40, %v1320_v38  ;;  %v1926_v43 = vadd.f32 %v1319_v37, %v450_v41  ;;  %v1434_v44 = vpop.f32.mrb[2].mxu1 }
  0xfa   :  { %v453_v45 = vpop.f32.mrb[3].mxu1 }
  0xfb   :  { %v1928_v46 = vadd.f32 %v1322_v42, %v453_v45  ;;  %v474_v54 = vmul.f32 %v1926_v43, %v1926_v43 }
  0xfd   :  { %v1323_v47 = vpop.f32.mrb[4].mxu0  ;;  %v475_v49 = vmul.f32 %v1928_v46, %v1928_v46  ;;  %v465_v55 = vadd.f32 %v1928_v46, %v1926_v43 }
  0xfe   :  { %v1324_v48 = vpop.f32.mrb[5].mxu0 }
  0xff   :  { %v1325_v50 = vadd.f32 %v1324_v48, %v1323_v47  ;;  %v1326_v52 = vpop.f32.mrb[6].mxu0  ;;  %v478_v59 = vadd.f32 %v475_v49, %v474_v54  ;;  %v33_v48 = vld [vmem:[%s2103_s3] sm:$0x3] }
 0x100   :  { %v1327_v53 = vpop.f32.mrb[7].mxu0 }
 0x101   :  { %v1936_v57 = vadd.f32 %v1433_v39, %v1325_v50  ;;  %v1328_v58 = vadd.f32 %v1327_v53, %v1326_v52 }
 0x103   :  { %v466_v60 = vadd.f32 %v465_v55, %v1936_v57  ;;  %v476_v62 = vmul.f32 %v1936_v57, %v1936_v57  ;;  %v1941_v63 = vadd.f32 %v1434_v44, %v1328_v58  ;;  %v1614_v55 = vld [vmem:[%s2102_s2] sm:$0xff]   ;;  %v1616_v58 = vld [vmem:[%s2102_s2 + $0x48] sm:$0xff]  }
 0x105   :  { %v479_v0 = vadd.f32 %v478_v59, %v476_v62  ;;  %v467_v1 = vadd.f32 %v466_v60, %v1941_v63  ;;  %v477_v3 = vmul.f32 %v1941_v63, %v1941_v63  ;;  %v1617_v60 = vld [vmem:[%s2102_s2 + $0x8] sm:$0xff]   ;;  %v1619_v62 = vld [vmem:[%s2102_s2 + $0x50] sm:$0xff]  }
 0x107   :  { %v468_v4 = vrot.slane %v467_v1, 4  ;;  %v480_v5 = vadd.f32 %v479_v0, %v477_v3  ;;  %v1620_v0 = vld [vmem:[%s2102_s2 + $0x10] sm:$0xff]   ;;  %v1623_v3 = vld [vmem:[%s2102_s2 + $0x18] sm:$0xff]  }
 0x109   :  { %v469_v7 = vadd.f32 %v468_v4, %v467_v1  ;;  %v481_v8 = vrot.slane %v480_v5, 4  ;;  %v1622_v1 = vld [vmem:[%s2102_s2 + $0x58] sm:$0xff]   ;;  %v1625_v4 = vld [vmem:[%s2102_s2 + $0x60] sm:$0xff]  }
 0x10b   :  { %v470_v11 = vrot.slane %v469_v7, 2  ;;  %v482_v12 = vadd.f32 %v481_v8, %v480_v5  ;;  %v1626_v5 = vld [vmem:[%s2102_s2 + $0x20] sm:$0xff]   ;;  %v1628_v8 = vld [vmem:[%s2102_s2 + $0x68] sm:$0xff]  }
 0x10d   :  { %v471_v15 = vadd.f32 %v470_v11, %v469_v7  ;;  %v483_v16 = vrot.slane %v482_v12, 2  ;;  %v1627_v7 = vld [vmem:[%s2102_s2 + $0xa0] sm:$0xff]   ;;  %v1629_v11 = vld [vmem:[%s2102_s2 + $0x28] sm:$0xff]  }
 0x10f   :  { %v472_v18 = vrot.slane %v471_v15, 1  ;;  %v484_v19 = vadd.f32 %v483_v16, %v482_v12  ;;  %v1630_v12 = vld [vmem:[%s2102_s2 + $0xa8] sm:$0xff]   ;;  %v1632_v16 = vld [vmem:[%s2102_s2 + $0x30] sm:$0xff]  }
 0x111   :  { %v485_v21 = vrot.slane %v484_v19, 1  ;;  %v473_v22 = vadd.f32 %v472_v18, %v471_v15  ;;  %v1631_v15 = vld [vmem:[%s2102_s2 + $0x70] sm:$0xff]  }
 0x112   :  { %v1633_v18 = vld [vmem:[%s2102_s2 + $0xb0] sm:$0xff]  }
 0x113   :  { %v486_v24 = vadd.f32 %v485_v21, %v484_v19  ;;  %v1634_v19 = vld [vmem:[%s2102_s2 + $0x78] sm:$0xff]  }
 0x114   :  { %v1635_v21 = vld [vmem:[%s2102_s2 + $0x38] sm:$0xff]  }
 0x115   :  { %v488_v25 = vsel %vm115_vm1, %v473_v22, %v486_v24  ;;  %v1636_v22 = vld [vmem:[%s2102_s2 + $0xb8] sm:$0xff]   ;;  %v671_v24 = vsub.s32 0, %v1724_v14 }
 0x116   :  { %1468 = vmatmul.mubr.f32.vlgmr.msra.gmra.mrb[8].mxu0 %v488_v25  ;;  %v679_v25 = vsub.s32 1, %v1724_v14 }
 0x117   :  { %1476 = vmatpush3.bf16.msra.mxu0 %v1615_v30 }
 0x118   :  { %1477 = vmatprep.subr.bf16.mxu0 %v1618_v31 }
 0x11b   :  { %1478 = vmatpush3.bf16.msra.mxu0 %v1618_v31 }
 0x11c   :  { %1479 = vmatprep.subr.bf16.mxu0 %v1621_v35 }
 0x11f   :  { %1480 = vmatpush3.bf16.msra.mxu0 %v1621_v35 }
 0x120   :  { %1481 = vmatprep.subr.bf16.mxu0 %v1624_v36 }
 0x123   :  { %1482 = vmatpush3.bf16.msra.mxu0 %v1624_v36 }
 0x124   :  { %1483 = vmatprep.subr.bf16.mxu0 %v1627_v7 }
 0x127   :  { %1484 = vmatpush3.bf16.msra.mxu0 %v1627_v7 }
 0x128   :  { %1485 = vmatprep.subr.bf16.mxu0 %v1630_v12 }
 0x12b   :  { %1486 = vmatpush3.bf16.msra.mxu0 %v1630_v12 }
 0x12c   :  { %1487 = vmatprep.subr.bf16.mxu0 %v1633_v18 }
 0x12f   :  { %1488 = vmatpush3.bf16.msra.mxu0 %v1633_v18 }
 0x130   :  { %1489 = vmatprep.subr.bf16.mxu0 %v1636_v22 }
 0x133   :  { %1490 = vmatpush3.bf16.msra.mxu0 %v1636_v22 }
 0x134   :  { %1530 = vmatprep.subr.mxu0 %v1644_v32 }
 0x1e9   :  { %v571_v37 = vpop.f32.mrb[8].mxu0 }
 0x1ea   :  { %v575_v38 = vmul.f32 0.001953125, %v571_v37  ;;  %v1469_v39 = vpop.f32.mrb[9].mxu0 }
 0x1ec   :  { %v576_v40 = vmul.f32 %v575_v38, %v575_v38 }
 0x1ee   :  { %v578_v41 = vrot.slane %v576_v40, 7 }
 0x1f0   :  { %v580_v42 = vsub.f32 %v575_v38, %v578_v41 }
 0x1f2   :  { %v581_v44 = vmax.f32 %v580_v42, 0.0 }
 0x1f4   :  { %v582_v45 = vadd.f32 1e-05, %v581_v44 }
 0x1f6   :  { %1637 = vrsqrt.f32 %v582_v45 }
 0x200   :  { %v1638_v47 = vpop.eup %1637 }
 0x201   :  { %v585_v49 = vrot.slane %v1638_v47, 1 }
 0x203   :  { %v587_v50 = vmul.f32 %v585_v49, %v33_v48 }
 0x205   :  { %v588_v52 = vmul.f32 %v587_v50, %v575_v38 }
 0x207   :  { %v590_v53 = vrot.slane %v588_v52, 7 }
 0x209   :  { %v592_v54 = vsub.f32 %v33_v48, %v590_v53 }
 0x20b   :  { %v593_v59 = vsel %vm115_vm1, %v587_v50, %v592_v54 }
 0x20c   :  { %1473 = vmatmul.mubr.msk.f32.vlgmr.msra.gmra.mrb[4].mxu1 %vm595_vm9, %v593_v59 }
 0x20d   :  { %1359 = vmatpush3.bf16.msra.mxu1 %v1614_v55 }
 0x20e   :  { %1360 = vmatprep.subr.bf16.mxu1 %v1616_v58 }
 0x211   :  { %1361 = vmatpush3.bf16.msra.mxu1 %v1617_v60 }
 0x212   :  { %1362 = vmatprep.subr.bf16.mxu1 %v1619_v62 }
 0x215   :  { %1363 = vmatpush3.bf16.msra.mxu1 %v1620_v0 }
 0x216   :  { %1364 = vmatprep.subr.bf16.mxu1 %v1622_v1 }
 0x219   :  { %1365 = vmatpush3.bf16.msra.mxu1 %v1623_v3 }
 0x21a   :  { %1366 = vmatprep.subr.bf16.mxu1 %v1625_v4 }
 0x21d   :  { %1367 = vmatpush3.bf16.msra.mxu1 %v1626_v5 }
 0x21e   :  { %1368 = vmatprep.subr.bf16.mxu1 %v1628_v8 }
 0x221   :  { %1369 = vmatpush3.bf16.msra.mxu1 %v1629_v11 }
 0x222   :  { %1370 = vmatprep.subr.bf16.mxu1 %v1631_v15 }
 0x225   :  { %1371 = vmatpush3.bf16.msra.mxu1 %v1632_v16 }
 0x226   :  { %1372 = vmatprep.subr.bf16.mxu1 %v1634_v19 }
 0x229   :  { %1373 = vmatpush3.bf16.msra.mxu1 %v1635_v21 }
 0x22a   :  { %1559 = vmatprep.subr.bf16.mxu1 %v1643_v10 }
 0x2df   :  { %v665_v28 = vpop.f32.mrb[4].mxu1 }
 0x2e0   :  { %v672_v30 = vrot.slane %v665_v28, %v671_v24  ;;  %v1474_v31 = vpop.f32.mrb[5].mxu1  ;;  %v680_v35 = vrot.slane %v665_v28, %v679_v25 }
 0x2e2   :  { %v675_v36 = vmul.f32 %v672_v30, %v1936_v57  ;;  %v676_v37 = vmul.f32 %v672_v30, %v1941_v63  ;;  %v673_v38 = vmul.f32 %v672_v30, %v1926_v43  ;;  %v674_v39 = vmul.f32 %v672_v30, %v1928_v46 }
 0x2e4   :  { %v683_v40 = vadd.f32 %v680_v35, %v675_v36  ;;  %v684_v41 = vadd.f32 %v680_v35, %v676_v37  ;;  %v681_v42 = vadd.f32 %v680_v35, %v673_v38  ;;  %v682_v44 = vadd.f32 %v680_v35, %v674_v39 }
 0x2e6   :  { %v687_v45 = vmax.f32 %v683_v40, 0.0  ;;  %v688_v47 = vmax.f32 %v684_v41, 0.0  ;;  %v685_v48 = vmax.f32 %v681_v42, 0.0  ;;  %v686_v49 = vmax.f32 %v682_v44, 0.0 }
 0x2e8   :  { %v690_v50 = vpack.c.bf16 %v688_v47, %v687_v45  ;;  %v689_v52 = vpack.c.bf16 %v686_v49, %v685_v48 }
 0x2ea   :  { %v693_v53 = vshrl.u32 %v689_v52, 16  ;;  %v696_v54 = vshll.u32 %v689_v52, 16  ;;  %946 = vmatprep.mubr.bf16.mxu1 %v689_v52  ;;  %v703_v57 = vshll.u32 %v690_v50, 16  ;;  %v700_v43 = vshrl.u32 %v690_v50, 16 }
 0x2ec   :  { %v695_v55 = vrot.slane %v693_v53, 7  ;;  %v712_v63 = vrot.slane %v696_v54, 1  ;;  %v714_v58 = vrot.slane %v703_v57, 1  ;;  %v702_v3 = vrot.slane %v700_v43, 7 }
 0x2ee   :  { %v698_v59 = vor.u32 %v696_v54, %v695_v55  ;;  %v713_v46 = vor.u32 %v712_v63, %v693_v53  ;;  %v716_v60 = vor.u32 %v714_v58, %v700_v43  ;;  %v705_v33 = vor.u32 %v703_v57, %v702_v3 }
 0x2f0   :  { %v709_v62 = vsel %vm1766_vm3, 0, %v698_v59  ;;  %v715_v0 = vsel %vm140_vm7, %v713_v46, %v714_v58  ;;  %v719_v1 = vsel %vm1801_vm13, %v716_v60, 0  ;;  %v706_v51 = vsel %vm97_vm0, %v695_v55, %v705_v33  ;;  %v691_v59 = vld [vmem:[%s2104_s4] sm:$0x3] }
 0x2f1   :  { %1289 = vmatmul.mubr.msk.bf16.vlgmr.msra.gmra.mrb[8].mxu1 %vm1808_vm15, %v709_v62  ;;  %1491 = vmatprep.mubr.msk.bf16.mxu0 %vm1818_vm4, %v715_v0 }
 0x2f2   :  { %954 = vmatprep.mubr.bf16.mxu1 %v690_v50  ;;  %1492 = vmatmul.mubr.msk.bf16.vlgmr.msra.gmra.mrb[12].mxu0 %vm1828_vm5, %v719_v1 }
 0x2f3   :  { %1561 = vmatpush3.bf16.msra.mxu1 %v1847_v9  ;;  %1531 = vmatpush3.msra.mxu0 %v1950_v27 }
 0x2f4   :  { %1562 = vmatprep.subr.bf16.mxu1 %v1643_v10  ;;  %1532 = vmatprep.mubr.msk.f32.mxu0 %vm1641_vm8, %v1644_v32 }
 0x2f7   :  { %1564 = vmatpush3.bf16.msra.mxu1 %v1858_v13 }
 0x2f8   :  { %1565 = vmatprep.subr.bf16.mxu1 %v1643_v10 }
 0x2f9   :  { %1291 = vmatmul.mubr.msk.bf16.gmra.mrb[12].mxu1 %vm1835_vm6, %v706_v51 }
 0x2fa   :  { %1527 = vmatprep.mubr.msk.f32.mxu1 %vm1641_vm8, %v1644_v32 }
 0x2fb   :  { %1567 = vmatpush3.bf16.msra.mxu1 %v1868_v17 }
 0x2fc   :  { %1568 = vmatprep.subr.bf16.mxu1 %v1643_v10 }
 0x2ff   :  { %1570 = vmatpush3.bf16.msra.mxu1 %v1878_v20 }
 0x300   :  { %1571 = vmatprep.subr.bf16.mxu1 %v1643_v10 }
 0x303   :  { %1573 = vmatpush3.bf16.msra.mxu1 %v1888_v23 }
 0x304   :  { %1574 = vmatprep.subr.bf16.mxu1 %v1643_v10 }
 0x307   :  { %1576 = vmatpush3.bf16.msra.mxu1 %v1898_v26 }
 0x308   :  { %1577 = vmatprep.subr.bf16.mxu1 %v1643_v10 }
 0x30b   :  { %1579 = vmatpush3.bf16.msra.mxu1 %v1908_v29 }
 0x30c   :  { %1580 = vmatprep.subr.bf16.mxu1 %v1643_v10 }
 0x30f   :  { %1582 = vmatpush3.bf16.msra.mxu1 %v1920_v34 }
 0x3c4   :  { %v1374_v56 = vpop.f32.mrb[8].mxu1 }
 0x3c5   :  { %v1375_v61 = vpop.f32.mrb[9].mxu1  ;;  %v1493_v2 = vpop.f32.mrb[12].mxu0 }
 0x3c6   :  { %v1376_v6 = vadd.f32 %v1375_v61, %v1374_v56  ;;  %v1377_v9 = vpop.f32.mrb[10].mxu1  ;;  %v997_v13 = vpop.f32.mrb[13].mxu0 }
 0x3c7   :  { %v1378_v17 = vpop.f32.mrb[11].mxu1  ;;  %v1494_v20 = vpop.f32.mrb[14].mxu0 }
 0x3c8   :  { %v998_v23 = vadd.f32 %v1376_v6, %v997_v13  ;;  %v1379_v32 = vadd.f32 %v1378_v17, %v1377_v9  ;;  %v1000_v27 = vpop.f32.mrb[15].mxu0 }
 0x3ca   :  { %v1001_v26 = vadd.f32 %v1379_v32, %v1000_v27  ;;  %v1021_v11 = vmul.f32 %v998_v23, %v998_v23 }
 0x3cc   :  { %v1380_v4 = vpop.f32.mrb[12].mxu1  ;;  %v1022_v7 = vmul.f32 %v1001_v26, %v1001_v26  ;;  %v1012_v34 = vadd.f32 %v1001_v26, %v998_v23 }
 0x3cd   :  { %v1381_v5 = vpop.f32.mrb[13].mxu1 }
 0x3ce   :  { %v1382_v29 = vadd.f32 %v1381_v5, %v1380_v4  ;;  %v1383_v8 = vpop.f32.mrb[14].mxu1  ;;  %v1025_v16 = vadd.f32 %v1022_v7, %v1021_v11 }
 0x3cf   :  { %v1384_v10 = vpop.f32.mrb[15].mxu1 }
 0x3d0   :  { %v1006_v12 = vadd.f32 %v1493_v2, %v1382_v29  ;;  %v1385_v15 = vadd.f32 %v1384_v10, %v1383_v8 }
 0x3d2   :  { %v1013_v18 = vadd.f32 %v1012_v34, %v1006_v12  ;;  %v1023_v19 = vmul.f32 %v1006_v12, %v1006_v12  ;;  %v1009_v21 = vadd.f32 %v1494_v20, %v1385_v15 }
 0x3d4   :  { %v1026_v22 = vadd.f32 %v1025_v16, %v1023_v19  ;;  %v1014_v28 = vadd.f32 %v1013_v18, %v1009_v21  ;;  %v1024_v30 = vmul.f32 %v1009_v21, %v1009_v21 }
 0x3d6   :  { %v1015_v31 = vrot.slane %v1014_v28, 4  ;;  %v1027_v35 = vadd.f32 %v1026_v22, %v1024_v30 }
 0x3d8   :  { %v1016_v36 = vadd.f32 %v1015_v31, %v1014_v28  ;;  %v1028_v37 = vrot.slane %v1027_v35, 4 }
 0x3da   :  { %v1017_v38 = vrot.slane %v1016_v36, 2  ;;  %v1029_v39 = vadd.f32 %v1028_v37, %v1027_v35 }
 0x3dc   :  { %v1018_v40 = vadd.f32 %v1017_v38, %v1016_v36  ;;  %v1030_v41 = vrot.slane %v1029_v39, 2 }
 0x3de   :  { %v1019_v42 = vrot.slane %v1018_v40, 1  ;;  %v1031_v44 = vadd.f32 %v1030_v41, %v1029_v39 }
 0x3e0   :  { %v1032_v45 = vrot.slane %v1031_v44, 1  ;;  %v1020_v47 = vadd.f32 %v1019_v42, %v1018_v40 }
 0x3e2   :  { %v1033_v48 = vadd.f32 %v1032_v45, %v1031_v44 }
 0x3e4   :  { %v1034_v49 = vsel %vm115_vm1, %v1020_v47, %v1033_v48 }
 0x3e5   :  { %1528 = vmatmul.mubr.f32.vlgmr.msra.gmra.mrb[6].mxu1 %v1034_v49 }
 0x4b8   :  { %v1101_v50 = vpop.f32.mrb[6].mxu1 }
 0x4b9   :  { %v1105_v52 = vmul.f32 0.001953125, %v1101_v50  ;;  %v1529_v53 = vpop.f32.mrb[7].mxu1 }
 0x4bb   :  { %v1106_v54 = vmul.f32 %v1105_v52, %v1105_v52 }
 0x4bd   :  { %v1108_v57 = vrot.slane %v1106_v54, 7 }
 0x4bf   :  { %v1110_v55 = vsub.f32 %v1105_v52, %v1108_v57 }
 0x4c1   :  { %v1111_v63 = vmax.f32 %v1110_v55, 0.0 }
 0x4c3   :  { %v1112_v58 = vadd.f32 1e-05, %v1111_v63 }
 0x4c5   :  { %1639 = vrsqrt.f32 %v1112_v58 }
 0x4cf   :  { %v1640_v43 = vpop.eup %1639 }
 0x4d0   :  { %v1115_v46 = vrot.slane %v1640_v43, 1 }
 0x4d2   :  { %v1117_v60 = vmul.f32 %v1115_v46, %v691_v59 }
 0x4d4   :  { %v1118_v62 = vmul.f32 %v1117_v60, %v1105_v52 }
 0x4d6   :  { %v1120_v0 = vrot.slane %v1118_v62, 7 }
 0x4d8   :  { %v1122_v1 = vsub.f32 %v691_v59, %v1120_v0 }
 0x4da   :  { %v1123_v3 = vsel %vm115_vm1, %v1117_v60, %v1122_v1 }
 0x4db   :  { %1533 = vmatmul.mubr.msk.f32.vlgmr.msra.gmra.mrb[10].mxu0 %vm595_vm9, %v1123_v3 }
 0x5ae   :  { %v1193_v33 = vpop.f32.mrb[10].mxu0 }
 0x5af   :  { %v1200_v51 = vrot.slane %v1193_v33, %v671_v24  ;;  %v1534_v56 = vpop.f32.mrb[11].mxu0  ;;  %v1208_v61 = vrot.slane %v1193_v33, %v679_v25 }
 0x5b1   :  { %v1201_v2 = vmul.f32 %v1200_v51, %v998_v23  ;;  %v1202_v6 = vmul.f32 %v1200_v51, %v1001_v26  ;;  %v1203_v9 = vmul.f32 %v1200_v51, %v1006_v12  ;;  %v1204_v13 = vmul.f32 %v1200_v51, %v1009_v21 }
 0x5b3   :  { %v1209_v17 = vadd.f32 %v1208_v61, %v1201_v2  ;;  %v1210_v20 = vadd.f32 %v1208_v61, %v1202_v6  ;;  %v1211_v32 = vadd.f32 %v1208_v61, %v1203_v9  ;;  %v1212_v27 = vadd.f32 %v1208_v61, %v1204_v13 }
 0x5b5   :  { %v1213_v4 = vmax.f32 %v1209_v17, 0.0  ;;  %v1214_v5 = vmax.f32 %v1210_v20, 0.0  ;;  %v1215_v7 = vmax.f32 %v1211_v32, 0.0  ;;  %v1216_v29 = vmax.f32 %v1212_v27, 0.0 }
 0x5b7   :  { %1217 = vst [vmem:[%s2105_s7] sm:$0xff] %v1213_v4  ;;  %1218 = vst [vmem:[%s2105_s7 + $0x8] sm:$0xff] %v1214_v5 }
 0x5b8   :  { %1219 = vst [vmem:[%s2105_s7 + $0x10] sm:$0xff] %v1215_v7  ;;  %1220 = vst [vmem:[%s2105_s7 + $0x18] sm:$0xff] %v1216_v29 }

</bundles_post_ra>
